<compile_context>
chip_gen: v5e
topology: v5e:2x2
jax: 0.10.0
libtpu: 0.0.40
codegen_flags: <defaults>
</compile_context>

<pallas_src>
import functools

import jax
import jax.numpy as jnp
from jax.experimental import pallas as pl
from jax.experimental.pallas import tpu as pltpu

IGNORE_INDEX = -100  # nn.CrossEntropyLoss default


def _round_up(x: int, m: int) -> int:
    return (x + m - 1) // m * m


def _finalize(i, labels, per_row, sum_ref, cnt_ref, *, n_rows, tm):
    """Reduce a (tm, 1) per-row loss to a per-row-block partial (sum, count)."""
    valid = labels != IGNORE_INDEX
    if n_rows % tm != 0:
        # Rows past n_rows in the padded last row block hold unspecified VMEM contents
        # (labels may be garbage, per_row may be NaN/Inf); jnp.where select semantics
        # guarantee the unselected branch is not propagated.
        row = i * tm + jax.lax.broadcasted_iota(jnp.int32, labels.shape, 0)
        valid = valid & (row < n_rows)
    loss_sum = jnp.sum(jnp.where(valid, per_row, 0.0))
    cnt = jnp.sum(valid.astype(jnp.float32))
    sum_ref[...] = jnp.full(sum_ref.shape, loss_sum, jnp.float32)
    cnt_ref[...] = jnp.full(cnt_ref.shape, cnt, jnp.float32)


def _ce_kernel_single(labels_ref, logits_ref, sum_ref, cnt_ref, *, n_rows, tm):
    """Fast path: the whole vocab fits in one tile -> single-pass LSE, no scratch carry."""
    i = pl.program_id(0)
    labels = labels_ref[...]                                           # (tm, 1) int32
    lane = jax.lax.broadcasted_iota(jnp.int32, logits_ref.shape, 1)

    # Per-consumer read+cast: each f32 tile has exactly one (fused) consumer chain,
    # so no full f32 copy of the tile needs to stay live across reduction passes.
    blk_max = jnp.max(logits_ref[...].astype(jnp.float32), axis=-1, keepdims=True)
    e_sum = jnp.sum(jnp.exp(logits_ref[...].astype(jnp.float32) - blk_max),
                    axis=-1, keepdims=True)
    lse = blk_max + jnp.log(e_sum)
    picked = jnp.sum(
        jnp.where(lane == labels, logits_ref[...].astype(jnp.float32), 0.0),
        axis=-1, keepdims=True)
    _finalize(i, labels, lse - picked, sum_ref, cnt_ref, n_rows=n_rows, tm=tm)


def _online_step(logits_ref, labels_local, m_sc, s_sc, p_sc, *, rem):
    """One online-logsumexp update for the current (tm, tv) vocab tile.

    rem: static number of valid columns in this tile (None => all tv columns valid).
    Only the ragged last vocab block is ever called with rem != None.
    """
    def x_f32():
        v = logits_ref[...].astype(jnp.float32)
        if rem is not None:
            lane_m = jax.lax.broadcasted_iota(jnp.int32, v.shape, 1)
            v = jnp.where(lane_m < rem, v, -jnp.inf)
        return v

    blk_max = jnp.max(x_f32(), axis=-1, keepdims=True)                 # (tm, 1)
    m_prev = m_sc[...]
    m_new = jnp.maximum(m_prev, blk_max)
    deg = m_new == -jnp.inf          # whole row is -inf so far (degenerate): avoid NaN
    alpha = jnp.where(deg, 0.0, jnp.exp(m_prev - m_new))
    e_sum = jnp.sum(jnp.exp(x_f32() - m_new), axis=-1, keepdims=True)
    s_sc[...] = s_sc[...] * alpha + jnp.where(deg, 0.0, e_sum)
    m_sc[...] = m_new

    # Label pick: lane-local iota vs (labels - block offset); exactly one vocab block
    # contributes per valid row, all other blocks add 0.
    lane = jax.lax.broadcasted_iota(jnp.int32, logits_ref.shape, 1)
    p_sc[...] += jnp.sum(jnp.where(lane == labels_local, x_f32(), 0.0),
                         axis=-1, keepdims=True)


def _ce_kernel_stream(labels_ref, logits_ref, sum_ref, cnt_ref,
                      m_sc, s_sc, p_sc, *, n_rows, vocab, tm, tv):
    """Streaming path: vocab tiled along grid axis 1 with an online logsumexp."""
    i = pl.program_id(0)          # row-block axis ("parallel")
    j = pl.program_id(1)          # vocab-block axis ("arbitrary", innermost)
    nj = pl.num_programs(1)

    @pl.when(j == 0)
    def _():
        m_sc[...] = jnp.full_like(m_sc, -jnp.inf)
        s_sc[...] = jnp.zeros_like(s_sc)
        p_sc[...] = jnp.zeros_like(p_sc)

    labels_local = labels_ref[...] - j * tv                            # (tm, 1) int32

    rem = vocab % tv              # static; 0 => no ragged last vocab block
    if rem == 0:
        _online_step(logits_ref, labels_local, m_sc, s_sc, p_sc, rem=None)
    else:
        # Only the last vocab block pays for the out-of-bounds column mask.
        @pl.when(j < nj - 1)
        def _():
            _online_step(logits_ref, labels_local, m_sc, s_sc, p_sc, rem=None)

        @pl.when(j == nj - 1)
        def _():
            _online_step(logits_ref, labels_local, m_sc, s_sc, p_sc, rem=rem)

    @pl.when(j == nj - 1)
    def _():
        per_row = (m_sc[...] + jnp.log(s_sc[...])) - p_sc[...]
        _finalize(i, labels_ref[...], per_row, sum_ref, cnt_ref, n_rows=n_rows, tm=tm)


@functools.partial(jax.jit, static_argnames=("tm", "tv"))
def gpt_lm_loss(logits: jax.Array, labels: jax.Array, *,
                tm: int = 256, tv: int = 8192) -> jax.Array:
    """Equivalent of GPTLMLoss.forward: mean CE of logits[..., :-1, :] vs labels[..., 1:]."""
    V = logits.shape[-1]

    # Shift labels only (tiny array): last position of every sequence -> IGNORE_INDEX,
    # preserving the ":-1" slice semantics without copying/reshaping the big logits.
    ignore_col = jnp.full(labels.shape[:-1] + (1,), IGNORE_INDEX, dtype=jnp.int32)
    shift_labels = jnp.concatenate([labels[..., 1:].astype(jnp.int32), ignore_col], axis=-1)

    flat_logits = logits.reshape(-1, V)      # contiguous reshape: no copy
    flat_labels = shift_labels.reshape(-1, 1)
    N = flat_logits.shape[0]
    itemsize = jnp.dtype(flat_logits.dtype).itemsize

    # Vocab tile: whole vocab (fast path, no online LSE) if it fits in one block,
    # else a multiple of 128.
    single = V <= tv
    tv_eff = V if single else max(128, (tv // 128) * 128)

    # Row tile: multiple of 16 (bf16-safe sublane packing); shrink if the logits tile
    # (2 buffers + f32 intermediate headroom) would blow the VMEM budget (v7x: 64 MiB).
    tm_eff = min(tm, _round_up(N, 16))
    tm_eff = max(16, (tm_eff // 16) * 16)
    tile_budget = 48 << 20
    while tm_eff > 16 and (2 * itemsize + 4) * tm_eff * tv_eff > tile_budget:
        tm_eff = max(16, (tm_eff // 2 // 16) * 16)

    rb = pl.cdiv(N, tm_eff)
    vb = 1 if single else pl.cdiv(V, tv_eff)

    vmem_need = (2 * tm_eff * tv_eff * itemsize      # double-buffered logits tile
                 + tm_eff * tv_eff * 4               # headroom for f32 intermediates
                 + 3 * tm_eff * 128 * 4              # m/s/p scratch (lane-padded)
                 + 2 * tm_eff * 128 * 4              # labels tile (lane-padded, 2 bufs)
                 + 4 * 8 * 128 * 4)                  # output tiles
    # Cap at 56 MiB: leaves compiler-internal scratch headroom on v7x (64 MiB physical).
    vmem_limit = int(min(max(vmem_need, 32 << 20), 56 << 20))

    cost = pl.CostEstimate(
        flops=6 * N * V,
        transcendentals=N * V,
        bytes_accessed=N * V * itemsize + N * 4 + 2 * rb * 8 * 128 * 4,
    )

    out_shape = (
        jax.ShapeDtypeStruct((rb, 8, 128), jnp.float32),
        jax.ShapeDtypeStruct((rb, 8, 128), jnp.float32),
    )

    if single:
        kernel = functools.partial(_ce_kernel_single, n_rows=N, tm=tm_eff)
        grid_spec = pltpu.PrefetchScalarGridSpec(
            num_scalar_prefetch=0,
            grid=(rb,),
            in_specs=[
                pl.BlockSpec((tm_eff, 1), lambda i: (i, 0)),            # labels tile
                pl.BlockSpec((tm_eff, tv_eff), lambda i: (i, 0)),       # full-vocab tile
            ],
            out_specs=(
                pl.BlockSpec((1, 8, 128), lambda i: (i, 0, 0)),         # partial loss sums
                pl.BlockSpec((1, 8, 128), lambda i: (i, 0, 0)),         # partial valid counts
            ),
        )
        # TODO(synk): on v7x consider pltpu.CORE_PARALLEL on the row axis to guarantee
        # both TensorCores are used; "parallel" is the portable megacore hint here.
        dims = ("parallel",)
    else:
        kernel = functools.partial(_ce_kernel_stream, n_rows=N, vocab=V,
                                   tm=tm_eff, tv=tv_eff)
        grid_spec = pltpu.PrefetchScalarGridSpec(
            num_scalar_prefetch=0,
            grid=(rb, vb),
            in_specs=[
                pl.BlockSpec((tm_eff, 1), lambda i, j: (i, 0)),         # labels tile
                pl.BlockSpec((tm_eff, tv_eff), lambda i, j: (i, j)),    # logits tile
            ],
            out_specs=(
                pl.BlockSpec((1, 8, 128), lambda i, j: (i, 0, 0)),      # partial loss sums
                pl.BlockSpec((1, 8, 128), lambda i, j: (i, 0, 0)),      # partial valid counts
            ),
            scratch_shapes=[
                pltpu.VMEM((tm_eff, 1), jnp.float32),                   # running max
                pltpu.VMEM((tm_eff, 1), jnp.float32),                   # running sum-exp
                pltpu.VMEM((tm_eff, 1), jnp.float32),                   # picked logit
            ],
        )
        dims = ("parallel", "arbitrary")

    sums, cnts = pl.pallas_call(
        kernel,
        out_shape=out_shape,
        grid_spec=grid_spec,
        compiler_params=pltpu.CompilerParams(
            dimension_semantics=dims,
            vmem_limit_bytes=vmem_limit,
        ),
        cost_estimate=cost,
    )(flat_labels, flat_logits)

    # Final scalar reduce + mean outside the kernel: better f32 accumulation and keeps
    # the row-block grid axis fully parallel.
    total = jnp.sum(sums[:, 0, 0])
    count = jnp.sum(cnts[:, 0, 0])
    # NOTE: if every label is IGNORE_INDEX this returns NaN (0/0), matching
    # torch.nn.CrossEntropyLoss(reduction="mean").
    return (total / count).astype(jnp.float32)


if __name__ == "__main__":
    def reference(lg, lb):
        v = lg.shape[-1]
        sl = lg[:, :-1, :].reshape(-1, v).astype(jnp.float32)
        st = lb[:, 1:].reshape(-1)
        picked = jnp.take_along_axis(sl, st[:, None], axis=1)[:, 0]
        return jnp.mean(jax.nn.logsumexp(sl, axis=-1) - picked)

    key = jax.random.PRNGKey(0)

    # 1) Single-vocab-block fast path (whole vocab fits in one tile).
    k1, k2 = jax.random.split(key)
    B, S, V = 2, 8, 128
    logits = jax.random.normal(k1, (B, S, V), dtype=jnp.float32)
    labels = jax.random.randint(k2, (B, S), 0, V, dtype=jnp.int32)
    loss = gpt_lm_loss(logits, labels)
    jax.block_until_ready(loss)
    ref = reference(logits, labels)
    assert jnp.allclose(loss, ref, atol=1e-5, rtol=1e-5), (loss, ref)

    # 2) Streaming path: ragged last vocab block (320 % 128 != 0) + ragged row block.
    k3, k4 = jax.random.split(k1)
    B, S, V = 3, 5, 320
    logits2 = jax.random.normal(k3, (B, S, V), dtype=jnp.float32)
    labels2 = jax.random.randint(k4, (B, S), 0, V, dtype=jnp.int32)
    loss2 = gpt_lm_loss(logits2, labels2, tm=16, tv=128)
    jax.block_until_ready(loss2)
    ref2 = reference(logits2, labels2)
    assert jnp.allclose(loss2, ref2, atol=1e-5, rtol=1e-5), (loss2, ref2)

    # 3) Streaming path with bf16 logits.
    logits3 = logits2.astype(jnp.bfloat16)
    loss3 = gpt_lm_loss(logits3, labels2, tm=16, tv=128)
    jax.block_until_ready(loss3)
    ref3 = reference(logits3.astype(jnp.float32), labels2)
    assert jnp.allclose(loss3, ref3, atol=1e-3, rtol=1e-3), (loss3, ref3)

    print("KERNEL_OK")
</pallas_src>

<mosaic_0001>
module attributes {stable_mosaic.version = 11 : i64} {
  func.func @_ce_kernel_single(%arg0: i32, %arg1: memref<16x1xi32, #tpu.memory_space<vmem>>, %arg2: memref<16x128xf32, #tpu.memory_space<vmem>>, %arg3: memref<1x8x128xf32, #tpu.memory_space<vmem>>, %arg4: memref<1x8x128xf32, #tpu.memory_space<vmem>>) attributes {dimension_semantics = [#tpu.dimension_semantics<parallel>], iteration_bounds = array<i64: 1>, scalar_prefetch = 0 : i64, scratch_operands = 0 : i64, tpu.core_type = #tpu.core_type<tc>, window_params = [{transform_indices = @transform_0, window_bounds = array<i64: 16, 1>}, {transform_indices = @transform_1, window_bounds = array<i64: 16, 128>}, {transform_indices = @transform_2, window_bounds = array<i64: 1, 8, 128>}, {transform_indices = @transform_3, window_bounds = array<i64: 1, 8, 128>}]} {
    %c0 = arith.constant 0 : index
    %c0_0 = arith.constant 0 : index
    %0 = vector.load %arg1[%c0, %c0_0] : memref<16x1xi32, #tpu.memory_space<vmem>>, vector<16x1xi32>
    %1 = tpu.iota {dimensions = array<i32: 1>} : vector<16x128xi32>
    %c0_1 = arith.constant 0 : index
    %c0_2 = arith.constant 0 : index
    %2 = vector.load %arg2[%c0_1, %c0_2] : memref<16x128xf32, #tpu.memory_space<vmem>>, vector<16x128xf32>
    %cst = arith.constant dense<0xFF800000> : vector<16xf32>
    %3 = vector.multi_reduction <maximumf>, %2, %cst [1] : vector<16x128xf32> to vector<16xf32>
    %4 = vector.shape_cast %3 : vector<16xf32> to vector<16x1xf32>
    %c0_3 = arith.constant 0 : index
    %c0_4 = arith.constant 0 : index
    %5 = vector.load %arg2[%c0_3, %c0_4] : memref<16x128xf32, #tpu.memory_space<vmem>>, vector<16x128xf32>
    %6 = vector.broadcast %4 : vector<16x1xf32> to vector<16x128xf32>
    %7 = arith.subf %5, %6 : vector<16x128xf32>
    %8 = math.exp %7 : vector<16x128xf32>
    %cst_5 = arith.constant dense<0.000000e+00> : vector<16xf32>
    %9 = vector.multi_reduction <add>, %8, %cst_5 [1] : vector<16x128xf32> to vector<16xf32>
    %10 = vector.shape_cast %9 : vector<16xf32> to vector<16x1xf32>
    %11 = math.log %10 : vector<16x1xf32>
    %12 = arith.addf %4, %11 : vector<16x1xf32>
    %13 = vector.broadcast %0 : vector<16x1xi32> to vector<16x128xi32>
    %14 = arith.cmpi eq, %1, %13 : vector<16x128xi32>
    %c0_6 = arith.constant 0 : index
    %c0_7 = arith.constant 0 : index
    %15 = vector.load %arg2[%c0_6, %c0_7] : memref<16x128xf32, #tpu.memory_space<vmem>>, vector<16x128xf32>
    %cst_8 = arith.constant 0.000000e+00 : f32
    %16 = vector.broadcast %cst_8 : f32 to vector<16x128xf32>
    %17 = arith.select %14, %15, %16 : vector<16x128xi1>, vector<16x128xf32>
    %cst_9 = arith.constant dense<0.000000e+00> : vector<16xf32>
    %18 = vector.multi_reduction <add>, %17, %cst_9 [1] : vector<16x128xf32> to vector<16xf32>
    %19 = vector.shape_cast %18 : vector<16xf32> to vector<16x1xf32>
    %20 = arith.subf %12, %19 : vector<16x1xf32>
    %c-100_i32 = arith.constant -100 : i32
    %21 = vector.broadcast %c-100_i32 : i32 to vector<16x1xi32>
    %22 = arith.cmpi ne, %0, %21 : vector<16x1xi32>
    %cst_10 = arith.constant 0.000000e+00 : f32
    %23 = vector.broadcast %cst_10 : f32 to vector<16x1xf32>
    %24 = arith.select %22, %20, %23 : vector<16x1xi1>, vector<16x1xf32>
    %25 = vector.shape_cast %24 : vector<16x1xf32> to vector<1x16x1xf32>
    %cst_11 = arith.constant dense<0.000000e+00> : vector<1xf32>
    %26 = vector.multi_reduction <add>, %25, %cst_11 [1, 2] : vector<1x16x1xf32> to vector<1xf32>
    %27 = vector.shape_cast %26 : vector<1xf32> to vector<1x1x1xf32>
    %28 = vector.extract %27[0, 0, 0] : f32 from vector<1x1x1xf32>
    %29 = arith.extui %22 : vector<16x1xi1> to vector<16x1xi32>
    %30 = arith.sitofp %29 : vector<16x1xi32> to vector<16x1xf32>
    %31 = vector.shape_cast %30 : vector<16x1xf32> to vector<1x16x1xf32>
    %cst_12 = arith.constant dense<0.000000e+00> : vector<1xf32>
    %32 = vector.multi_reduction <add>, %31, %cst_12 [1, 2] : vector<1x16x1xf32> to vector<1xf32>
    %33 = vector.shape_cast %32 : vector<1xf32> to vector<1x1x1xf32>
    %34 = vector.extract %33[0, 0, 0] : f32 from vector<1x1x1xf32>
    %35 = vector.broadcast %28 : f32 to vector<1x8x128xf32>
    %c0_13 = arith.constant 0 : index
    %c0_14 = arith.constant 0 : index
    %c0_15 = arith.constant 0 : index
    %36 = vector.load %arg3[%c0_13, %c0_14, %c0_15] : memref<1x8x128xf32, #tpu.memory_space<vmem>>, vector<1x8x128xf32>
    tpu.vector_store %arg3[%c0_13, %c0_14, %c0_15], %35 {strides = array<i32>} : memref<1x8x128xf32, #tpu.memory_space<vmem>>, vector<1x8x128xf32>,
    %37 = vector.broadcast %34 : f32 to vector<1x8x128xf32>
    %c0_16 = arith.constant 0 : index
    %c0_17 = arith.constant 0 : index
    %c0_18 = arith.constant 0 : index
    %38 = vector.load %arg4[%c0_16, %c0_17, %c0_18] : memref<1x8x128xf32, #tpu.memory_space<vmem>>, vector<1x8x128xf32>
    tpu.vector_store %arg4[%c0_16, %c0_17, %c0_18], %37 {strides = array<i32>} : memref<1x8x128xf32, #tpu.memory_space<vmem>>, vector<1x8x128xf32>,
    return
  }
  func.func @transform_0(%arg0: i32) -> (i32, i32) {
    %c0_i32 = arith.constant 0 : i32
    %c0_i32_0 = arith.constant 0 : i32
    return %arg0, %c0_i32 : i32, i32
  }
  func.func @transform_1(%arg0: i32) -> (i32, i32) {
    %c0_i32 = arith.constant 0 : i32
    %c0_i32_0 = arith.constant 0 : i32
    return %arg0, %c0_i32 : i32, i32
  }
  func.func @transform_2(%arg0: i32) -> (i32, i32, i32) {
    %c0_i32 = arith.constant 0 : i32
    %c0_i32_0 = arith.constant 0 : i32
    %c0_i32_1 = arith.constant 0 : i32
    return %arg0, %c0_i32, %c0_i32_0 : i32, i32, i32
  }
  func.func @transform_3(%arg0: i32) -> (i32, i32, i32) {
    %c0_i32 = arith.constant 0 : i32
    %c0_i32_0 = arith.constant 0 : i32
    %c0_i32_1 = arith.constant 0 : i32
    return %arg0, %c0_i32, %c0_i32_0 : i32, i32, i32
  }
}

</mosaic_0001>

<bundles_post_ra>
// kernel: gpt_lm_loss.1
= control target key start
LH: loop header
LB: loop body
LE: loop exit
PB: predicated region body
PF: predicated region fallthrough
CT: control target
= control target key end

     0   :  { %v118_v1 = vmov 0   ;;  %v15_v5 = vlaneseq  ;;  %v119_v19 = vmov 0.0   ;;  %vm59_vm4 = vcmask 7168   ;;  %s166_s1 = inlined_call_operand.vmem [shape: f32[16,128], index: 1, kind: input, shape index: {}]   ;;  %s167_s0 = inlined_call_operand.vmem [shape: s32[16,1], index: 0, kind: input, shape index: {}]   ;;  %s168_s2 = inlined_call_operand.vmem [shape: f32[1,8,128], index: 2, kind: output, shape index: {0}]   ;;  %s169_s3 = inlined_call_operand.vmem [shape: f32[1,8,128], index: 3, kind: output, shape index: {1}]  }
   0x1   :  { %v17_v0 = vld [vmem:[%s166_s1] sm:$0xff]  ;;  %108 = vset.pattern.permute.xlu1 %v118_v1  ;;  %109 = vset.pattern.permute.xlu0 %v118_v1  ;;  %v18_v3 = vld [vmem:[%s166_s1 + $0x8] sm:$0xff] }
   0x2   :  { %v13_v2 = vld [vmem:[%s167_s0] sm:$0xff]  ;;  %19 = vmax.xlane.f32.xlu0 %v17_v0  ;;  %v14_v4 = vld [vmem:[%s167_s0 + $0x8] sm:$0xff]  ;;  %v16_v6 = vand.u32 127, %v15_v5 }
   0x3   :  { %40 = vperm.xlu1 %108, %v13_v2   ;;  %vm55_vm2 = vcmp.ne.s32.totalorder %v13_v2, 4294967196  ;;  %vm56_vm3 = vcmp.ne.s32.totalorder %v14_v4, 4294967196 }
   0x4   :  { %v100_v20 = vsel %vm55_vm2, 1.0, %v119_v19  ;;  %v101_v21 = vsel %vm56_vm3, 1.0, %v119_v19 }
   0x5   :  { %v76_v22 = vsel %vm59_vm4, %v100_v20, 0.0  ;;  %v77_v23 = vsel %vm59_vm4, %v101_v21, 0.0 }
   0x6   :  { %v78_v24 = vadd.f32 %v77_v23, %v76_v22 }
   0xa   :  { %21 = vmax.xlane.f32.xlu0 %v18_v3 }
   0xb   :  { %43 = vperm.xlu1 %108, %v14_v4  }
  0x75   :  { %v41_v7 = vpop.permute.xlu1 %40  ;;  %v20_v8 = vpop.xlane.xlu0 %19 }
  0x76   :  { %vm45_vm0 = vcmp.eq.s32.totalorder %v16_v6, %v41_v7  ;;  %v23_v9 = vsub.f32 %v17_v0, %v20_v8 }
  0x77   :  { %v47_v10 = vsel %vm45_vm0, %v17_v0, 0.0 }
  0x78   :  { %49 = vadd.xlane.f32.xlu0 %v47_v10  ;;  %v25_v11 = vmul.f32 1.442695, %v23_v9 }
  0x7a   :  { %110 = vpow2.f32 %v25_v11 }
  0x7d   :  { %v44_v12 = vpop.permute.xlu1 %43  ;;  %v22_v13 = vpop.xlane.xlu0 %21 }
  0x7e   :  { %vm46_vm1 = vcmp.eq.s32.totalorder %v16_v6, %v44_v12  ;;  %v24_v14 = vsub.f32 %v18_v3, %v22_v13 }
  0x7f   :  { %v48_v15 = vsel %vm46_vm1, %v18_v3, 0.0 }
  0x80   :  { %51 = vadd.xlane.f32.xlu1 %v48_v15  ;;  %v111_v16 = vpop.eup %110  ;;  %v27_v17 = vmul.f32 1.442695, %v24_v14  ;;  %79 = vadd.xlane.f32.xlu0 %v78_v24 }
  0x81   :  { %29 = vadd.xlane.f32.xlu2 %v111_v16 }
  0x82   :  { %112 = vpow2.f32 %v27_v17 }
  0x88   :  { %v113_v18 = vpop.eup %112 }
  0x89   :  { %31 = vadd.xlane.f32.xlu2 %v113_v18 }
  0xeb   :  { %v50_v30 = vpop.xlane.xlu0 %49 }
  0xf3   :  { %v52_v35 = vpop.xlane.xlu1 %51  ;;  %v80_v42 = vpop.xlane.xlu0 %79 }
  0xf4   :  { %v30_v25 = vpop.xlane.xlu2 %29  ;;  %v81_v43 = vrot.slane %v80_v42, 4 }
  0xf5   :  { %114 = vlog2.f32 %v30_v25 }
  0xf6   :  { %v82_v44 = vadd.f32 %v81_v43, %v80_v42 }
  0xf8   :  { %v83_v45 = vrot.slane %v82_v44, 2 }
  0xfa   :  { %v84_v49 = vadd.f32 %v83_v45, %v82_v44 }
  0xfb   :  { %v115_v26 = vpop.eup %114 }
  0xfc   :  { %v34_v27 = vmul.f32 0.6931472, %v115_v26  ;;  %v32_v28 = vpop.xlane.xlu2 %31  ;;  %v85_v52 = vrot.slane %v84_v49, 1 }
  0xfd   :  { %116 = vlog2.f32 %v32_v28 }
  0xfe   :  { %v37_v29 = vadd.f32 %v34_v27, %v20_v8  ;;  %v86_v55 = vadd.f32 %v85_v52, %v84_v49 }
 0x100   :  { %v53_v33 = vsub.f32 %v37_v29, %v50_v30 }
 0x102   :  { %v57_v36 = vsel %vm55_vm2, %v53_v33, 0.0 }
 0x103   :  { %v117_v31 = vpop.eup %116  ;;  %v60_v39 = vsel %vm59_vm4, %v57_v36, 0.0 }
 0x104   :  { %v36_v32 = vmul.f32 0.6931472, %v117_v31 }
 0x106   :  { %v38_v34 = vadd.f32 %v36_v32, %v22_v13 }
 0x108   :  { %v54_v37 = vsub.f32 %v38_v34, %v52_v35 }
 0x10a   :  { %v58_v38 = vsel %vm56_vm3, %v54_v37, 0.0 }
 0x10b   :  { %v61_v40 = vsel %vm59_vm4, %v58_v38, 0.0 }
 0x10c   :  { %v62_v41 = vadd.f32 %v61_v40, %v60_v39 }
 0x10e   :  { %63 = vadd.xlane.f32.xlu2 %v62_v41 }
 0x181   :  { %v64_v46 = vpop.xlane.xlu2 %63 }
 0x182   :  { %v65_v47 = vrot.slane %v64_v46, 4 }
 0x184   :  { %v66_v48 = vadd.f32 %v65_v47, %v64_v46 }
 0x186   :  { %v67_v50 = vrot.slane %v66_v48, 2 }
 0x188   :  { %v68_v51 = vadd.f32 %v67_v50, %v66_v48 }
 0x18a   :  { %v69_v53 = vrot.slane %v68_v51, 1 }
 0x18c   :  { %v70_v54 = vadd.f32 %v69_v53, %v68_v51 }
 0x18e   :  { %102 = vpush %v70_v54 }
 0x18f   :  { %104 = vpush %v86_v55 }
 0x1bf   :  { %s103_s0 = spop %102 }
 0x1c0   :  { %v88_v56 = vstv %s103_s0  ;;  %s105_s1 = spop %104 }
 0x1c1   :  { %89 = vst [vmem:[%s168_s2] sm:$0xff] %v88_v56  ;;  %v90_v57 = vstv %s105_s1 }
 0x1c2   :  { %91 = vst [vmem:[%s169_s3] sm:$0xff] %v90_v57 }

</bundles_post_ra>
